<compile_context>
chip_gen: v6e
topology: v6e:2x2x1
jax: 0.10.0
libtpu: 0.0.40
codegen_flags: <defaults>
</compile_context>

<pallas_src>
import functools

import jax
import jax.numpy as jnp
from jax.experimental import pallas as pl
from jax.experimental.pallas import tpu as pltpu


def _joints_mse_partial_kernel(w_ref, pred_ref, gt_ref, o_ref, *,
                               use_target_weight, vreg_reduce):
    # pred_ref/gt_ref: (TR, P) row tile of the flattened (B*J, H*W) heatmaps.
    diff = pred_ref[...].astype(jnp.float32) - gt_ref[...].astype(jnp.float32)
    if use_target_weight:
        # (TR, 1) weight column broadcasts over the spatial (lane) axis.
        diff = diff * w_ref[...].astype(jnp.float32)
    sq = diff * diff  # (TR, P)

    if vreg_reduce:
        tr, p = sq.shape
        # Lane-chunk reduction: combine the P//128 lane groups (VPU adds).
        part = sq.reshape(tr, p // 128, 128).sum(axis=1)      # (TR, 128)
        # Sublane-group reduction: combine the TR//8 sublane groups (VPU adds).
        part = part.reshape(tr // 8, 8, 128).sum(axis=0)      # (8, 128)
        o_ref[0] = part
    else:
        # Rare fallback (P not a multiple of 128 or TR not a multiple of 8):
        # scalar reduction, written into lane/sublane (0,0) of the partial block.
        s = jnp.sum(sq)
        row = jax.lax.broadcasted_iota(jnp.int32, (8, 128), 0)
        col = jax.lax.broadcasted_iota(jnp.int32, (8, 128), 1)
        o_ref[0] = jnp.where((row == 0) & (col == 0), s, jnp.float32(0.0))


def _choose_tile_rows(R, P, bytes_per_elem=4, budget_bytes=4 * 1024 * 1024):
    """Largest multiple-of-8 divisor of R whose (TR, P) tile fits the budget."""
    max_rows = max(8, budget_bytes // max(1, P * bytes_per_elem))
    best = None
    for tr in range(8, R + 1, 8):
        if R % tr == 0 and tr <= max_rows:
            best = tr
    if best is not None:
        return best
    for tr in range(8, R + 1, 8):      # no divisor fits the budget: smallest valid
        if R % tr == 0:
            return tr
    return R                           # R < 8 or no multiple-of-8 divisor: full extent


def joints_mse_loss(output, target, target_weight, *, use_target_weight=True):
    """output, target: (B, J, H, W); target_weight: (B, J, 1). Returns scalar loss."""
    B, J, H, W = output.shape
    P = H * W
    R = B * J

    # Free contiguous reshapes (no transpose, no extra HBM copy).
    pred = output.reshape(R, P)
    gt = target.reshape(R, P)
    w = target_weight.reshape(R, 1).astype(jnp.float32)

    TR = _choose_tile_rows(R, P)
    num_tiles = R // TR
    vreg_reduce = (TR % 8 == 0) and (P % 128 == 0)

    kernel = functools.partial(
        _joints_mse_partial_kernel,
        use_target_weight=use_target_weight,
        vreg_reduce=vreg_reduce,
    )

    partials = pl.pallas_call(
        kernel,
        out_shape=jax.ShapeDtypeStruct((num_tiles, 8, 128), jnp.float32),
        grid_spec=pltpu.PrefetchScalarGridSpec(
            num_scalar_prefetch=0,
            grid=(num_tiles,),
            in_specs=[
                pl.BlockSpec((TR, 1), lambda i: (i, 0)),   # target_weight rows
                pl.BlockSpec((TR, P), lambda i: (i, 0)),   # pred row tile
                pl.BlockSpec((TR, P), lambda i: (i, 0)),   # gt row tile
            ],
            out_specs=pl.BlockSpec((1, 8, 128), lambda i: (i, 0, 0)),
        ),
        compiler_params=pltpu.CompilerParams(
            dimension_semantics=("parallel",),              # independent tiles; v7x megacore
            vmem_limit_bytes=32 * 1024 * 1024,
        ),
    )(w, pred, gt)

    # Tiny final reduction + scale in plain JAX.
    total = jnp.sum(partials)
    return 0.5 * total / jnp.float32(R * P)


def _reference_loss(output, target, target_weight, use_target_weight=True):
    B, J, H, W = output.shape
    pred = output.reshape(B, J, -1).astype(jnp.float32)
    gt = target.reshape(B, J, -1).astype(jnp.float32)
    w = target_weight.reshape(B, J, 1).astype(jnp.float32)
    loss = 0.0
    for idx in range(J):
        p = pred[:, idx]
        g = gt[:, idx]
        if use_target_weight:
            p = p * w[:, idx]
            g = g * w[:, idx]
        loss += 0.5 * jnp.mean((p - g) ** 2)
    return loss / J


if __name__ == "__main__":
    # Small shapes consistent with the module: B=2, J=4 joints, 16x16 heatmaps.
    key = jax.random.PRNGKey(0)
    k1, k2, k3 = jax.random.split(key, 3)
    B, J, H, W = 2, 4, 16, 16
    output = jax.random.normal(k1, (B, J, H, W), dtype=jnp.float32)
    target = jax.random.normal(k2, (B, J, H, W), dtype=jnp.float32)
    target_weight = jax.random.uniform(k3, (B, J, 1), dtype=jnp.float32)

    loss_w = joints_mse_loss(output, target, target_weight, use_target_weight=True)
    loss_w = jax.block_until_ready(loss_w)
    ref_w = _reference_loss(output, target, target_weight, use_target_weight=True)
    assert jnp.allclose(loss_w, ref_w, rtol=1e-5, atol=1e-6), (loss_w, ref_w)

    loss_nw = joints_mse_loss(output, target, target_weight, use_target_weight=False)
    loss_nw = jax.block_until_ready(loss_nw)
    ref_nw = _reference_loss(output, target, target_weight, use_target_weight=False)
    assert jnp.allclose(loss_nw, ref_nw, rtol=1e-5, atol=1e-6), (loss_nw, ref_nw)

    print("KERNEL_OK")
</pallas_src>

<mosaic_0001>
module attributes {stable_mosaic.version = 11 : i64} {
  func.func @_joints_mse_partial_kernel(%arg0: i32, %arg1: memref<8x1xf32, #tpu.memory_space<vmem>>, %arg2: memref<8x256xf32, #tpu.memory_space<vmem>>, %arg3: memref<8x256xf32, #tpu.memory_space<vmem>>, %arg4: memref<1x8x128xf32, #tpu.memory_space<vmem>>) attributes {dimension_semantics = [#tpu.dimension_semantics<parallel>], iteration_bounds = array<i64: 1>, scalar_prefetch = 0 : i64, scratch_operands = 0 : i64, tpu.core_type = #tpu.core_type<tc>, window_params = [{transform_indices = @transform_0, window_bounds = array<i64: 8, 1>}, {transform_indices = @transform_1, window_bounds = array<i64: 8, 256>}, {transform_indices = @transform_2, window_bounds = array<i64: 8, 256>}, {transform_indices = @transform_3, window_bounds = array<i64: 1, 8, 128>}]} {
    %c0 = arith.constant 0 : index
    %c0_0 = arith.constant 0 : index
    %0 = vector.load %arg2[%c0, %c0_0] : memref<8x256xf32, #tpu.memory_space<vmem>>, vector<8x256xf32>
    %c0_1 = arith.constant 0 : index
    %c0_2 = arith.constant 0 : index
    %1 = vector.load %arg3[%c0_1, %c0_2] : memref<8x256xf32, #tpu.memory_space<vmem>>, vector<8x256xf32>
    %2 = arith.subf %0, %1 : vector<8x256xf32>
    %c0_3 = arith.constant 0 : index
    %c0_4 = arith.constant 0 : index
    %3 = vector.load %arg1[%c0_3, %c0_4] : memref<8x1xf32, #tpu.memory_space<vmem>>, vector<8x1xf32>
    %4 = vector.broadcast %3 : vector<8x1xf32> to vector<8x256xf32>
    %5 = arith.mulf %2, %4 : vector<8x256xf32>
    %6 = arith.mulf %5, %5 : vector<8x256xf32>
    %7 = vector.shape_cast %6 : vector<8x256xf32> to vector<8x2x128xf32>
    %cst = arith.constant dense<0.000000e+00> : vector<8x128xf32>
    %8 = vector.multi_reduction <add>, %7, %cst [1] : vector<8x2x128xf32> to vector<8x128xf32>
    %9 = vector.shape_cast %8 : vector<8x128xf32> to vector<1x8x128xf32>
    %cst_5 = arith.constant dense<0.000000e+00> : vector<8x128xf32>
    %10 = vector.multi_reduction <add>, %9, %cst_5 [0] : vector<1x8x128xf32> to vector<8x128xf32>
    %c0_6 = arith.constant 0 : index
    %c0_7 = arith.constant 0 : index
    %c0_8 = arith.constant 0 : index
    %11 = vector.load %arg4[%c0_6, %c0_7, %c0_8] : memref<1x8x128xf32, #tpu.memory_space<vmem>>, vector<1x8x128xf32>
    %12 = vector.shape_cast %11 : vector<1x8x128xf32> to vector<8x128xf32>
    %13 = vector.shape_cast %10 : vector<8x128xf32> to vector<1x8x128xf32>
    tpu.vector_store %arg4[%c0_6, %c0_7, %c0_8], %13 {strides = array<i32>} : memref<1x8x128xf32, #tpu.memory_space<vmem>>, vector<1x8x128xf32>,
    return
  }
  func.func @transform_0(%arg0: i32) -> (i32, i32) {
    %c0_i32 = arith.constant 0 : i32
    %c0_i32_0 = arith.constant 0 : i32
    return %arg0, %c0_i32 : i32, i32
  }
  func.func @transform_1(%arg0: i32) -> (i32, i32) {
    %c0_i32 = arith.constant 0 : i32
    %c0_i32_0 = arith.constant 0 : i32
    return %arg0, %c0_i32 : i32, i32
  }
  func.func @transform_2(%arg0: i32) -> (i32, i32) {
    %c0_i32 = arith.constant 0 : i32
    %c0_i32_0 = arith.constant 0 : i32
    return %arg0, %c0_i32 : i32, i32
  }
  func.func @transform_3(%arg0: i32) -> (i32, i32, i32) {
    %c0_i32 = arith.constant 0 : i32
    %c0_i32_0 = arith.constant 0 : i32
    %c0_i32_1 = arith.constant 0 : i32
    return %arg0, %c0_i32, %c0_i32_0 : i32, i32, i32
  }
}

</mosaic_0001>

<bundles_post_ra>
// kernel: tpu_custom_call.1
= control target key start
LH: loop header
LB: loop body
LE: loop exit
PB: predicated region body
PF: predicated region fallthrough
CT: control target
= control target key end

     0   :  { %8 = vsyncpa [#allocation3], 0  ;;  %s348_s0 = inlined_call_operand.vmem [shape: f32[8,1], index: 0, kind: input, shape index: {}]   ;;  %s349_s1 = inlined_call_operand.hbm [shape: f32[8,256], index: 1, kind: input, shape index: {}]   ;;  %s350_s2 = inlined_call_operand.hbm [shape: f32[8,256], index: 2, kind: input, shape index: {}]   ;;  %s351_s3 = inlined_call_operand.hbm [shape: f32[1,8,128], index: 3, kind: output, shape index: {}]  }
   0x1   :  { %9 = vsyncpa [#allocation6], 0 }
   0x2   :  { %10 = vsyncpa [#allocation4], 0  ;;  %s300_s12 = smov [#allocation2]   ;;  %s301_s14 = smov [#allocation5]  }
   0x3   :  { %s19_s13 = sshll.u32 %s300_s12, 4  ;;  %s29_s15 = sshll.u32 %s301_s14, 4  ;;  %s20_s13 = int_to_ptr.vmem [resolvable:$true] %s19_s13  ;;  %s30_s15 = int_to_ptr.vmem [resolvable:$true] %s29_s15 }
   0x4   :  { %s242_s16 = scalar_lea.vmem %s20_s13, 256  ;;  %p247_p1 = scmp.lt.s32.totalorder %s20_s13, %s20_s13 }
   0x5   :  { %p243_p0 = scmp.ne.s32.totalorder %s20_s13, %s242_s16  ;;  %p248_p2 = scmp.lt.s32.totalorder %s242_s16, %s242_s16 }
   0x7   :  { %p249_p3 = por %p248_p2, %p247_p1 }
   0x9   :  { %p250_p4 = pnand %p249_p3, %p243_p0 }
   0xb   :  { %253 = shalt.err (!%p250_p4)
}
   0xc   :  { %22 = dma.hbm_to_vmem [thread:$0]  %s349_s1, 256, %s20_s13, [#allocation3]  }
   0xd   :  { %s262_s19 = scalar_lea.vmem %s30_s15, 256  ;;  %p267_p6 = scmp.lt.s32.totalorder %s30_s15, %s30_s15 }
   0xe   :  { %p263_p5 = scmp.ne.s32.totalorder %s30_s15, %s262_s19  ;;  %p268_p7 = scmp.lt.s32.totalorder %s262_s19, %s262_s19 }
  0x10   :  { %p269_p8 = por %p268_p7, %p267_p6 }
  0x12   :  { %p270_p9 = pnand %p269_p8, %p263_p5 }
  0x14   :  { %273 = shalt.err (!%p270_p9)
}
  0x15   :  { %32 = dma.hbm_to_vmem [thread:$0]  %s350_s2, 256, %s30_s15, [#allocation6]  }
  0x16   :  { %294 = dma.done.wait [#allocation3], 256  }
  0x17   :  { %295 = vsyncadd [#allocation3], 4294967040 }
  0x18   :  { %296 = dma.done.wait [#allocation6], 256  }
  0x19   :  { %297 = vsyncadd [#allocation6], 4294967040  ;;  %v302_v0 = vmov 0   ;;  %v45_v1 = vld [vmem:[%s348_s0] sm:$0xff]  ;;  %v303_v2 = vmov 1983009808   ;;  %v59_v4 = vlaneseq }
  0x1a   :  { %233 = vset.pattern.permute.xlu0 %v302_v0  ;;  %v57_v3 = vunpack.c.l.s4 %v303_v2  ;;  %v39_v5 = vld [vmem:[#allocation2] sm:$0xff]  ;;  %v40_v6 = vld [vmem:[#allocation2 + $0x8] sm:$0xff]  ;;  %v41_v7 = vld [vmem:[#allocation5] sm:$0xff]  ;;  %v304_v9 = vmov 1934713408   ;;  %v305_v23 = vmov 0.0  }
  0x1b   :  { %48 = vperm.xlu0 %233, %v45_v1   ;;  %v42_v8 = vld [vmem:[#allocation5 + $0x8] sm:$0xff]  ;;  %v88_v10 = vunpack.c.l.s4 %v304_v9  ;;  %v60_v12 = vshrl.u32 %v59_v4, 7  ;;  %v43_v13 = vsub.f32 %v39_v5, %v41_v7  ;;  %vm121_vm0 = vcmask 1041408   ;;  %s306_s0 = smov [#allocation7]  }
  0x1c   :  { %v58_v11 = vunpack.c.0.s8 %v57_v3  ;;  %v44_v14 = vsub.f32 %v40_v6, %v42_v8  ;;  %vm194_vm1 = vcmask 1041409   ;;  %vm196_vm2 = vcmask 1042434   ;;  %s216_s1 = sshll.u32 %s306_s0, 4  ;;  %s217_s1 = int_to_ptr.vmem [resolvable:$true] %s216_s1 }
  0x1d   :  { %v89_v15 = vunpack.c.0.s8 %v88_v10  ;;  %vm198_vm3 = vcmask 1043459   ;;  %vm200_vm4 = vcmask 1044484   ;;  %vm202_vm5 = vcmask 1045509   ;;  %s274_s2 = scalar_lea.vmem %s217_s1, 128  ;;  %p279_p11 = scmp.lt.s32.totalorder %s217_s1, %s217_s1 }
  0x1e   :  { %v61_v17 = vsub.s32 %v58_v11, %v60_v12  ;;  %vm204_vm6 = vcmask 1046534   ;;  %vm206_vm7 = vcmask 1047559   ;;  %p275_p10 = scmp.ne.s32.totalorder %s217_s1, %s274_s2  ;;  %p280_p12 = scmp.lt.s32.totalorder %s274_s2, %s274_s2 }
  0x1f   :  { %v92_v22 = vsub.s32 %v89_v15, %v60_v12 }
  0x20   :  { %p281_p13 = por %p280_p12, %p279_p11 }
  0x22   :  { %p282_p0 = pnand %p281_p13, %p275_p10 }
  0x96   :  { %v49_v16 = vpop.permute.xlu0 %48 }
  0x97   :  { %v51_v18 = vmul.f32 %v49_v16, %v43_v13  ;;  %v52_v19 = vmul.f32 %v49_v16, %v44_v14 }
  0x99   :  { %v53_v20 = vmul.f32 %v51_v18, %v51_v18  ;;  %v54_v21 = vmul.f32 %v52_v19, %v52_v19 }
  0x9b   :  { %v55_v24 = vcombine.high %v53_v20, %v305_v23  ;;  %v62_v25 = vrot.slane %v53_v20, %v61_v17  ;;  %v70_v26 = vcombine.high %v54_v21, %v305_v23  ;;  %v77_v27 = vrot.slane %v54_v21, %v61_v17 }
  0x9d   :  { %v69_v28 = vrot.slane %v55_v24, %v61_v17  ;;  %v84_v29 = vrot.slane %v70_v26, %v61_v17  ;;  %v85_v30 = vcombine.low %v62_v25, %v77_v27  ;;  %v86_v31 = vcombine.high %v62_v25, %v77_v27 }
  0x9f   :  { %v93_v32 = vrot.slane %v85_v30, %v92_v22  ;;  %v100_v33 = vrot.slane %v86_v31, %v92_v22  ;;  %v101_v34 = vcombine.low %v69_v28, %v84_v29  ;;  %v102_v35 = vcombine.high %v69_v28, %v84_v29 }
  0xa1   :  { %v109_v36 = vrot.slane %v101_v34, %v92_v22  ;;  %v116_v37 = vrot.slane %v102_v35, %v92_v22  ;;  %v117_v38 = vcombine.high %v93_v32, %v305_v23  ;;  %v118_v39 = vcombine.high %v100_v33, %v305_v23 }
  0xa2   :  { %v122_v40 = vsel %vm121_vm0, %v93_v32, 0.0  ;;  %v136_v41 = vsel %vm121_vm0, %v100_v33, 0.0 }
  0xa3   :  { %v119_v42 = vcombine.high %v109_v36, %v305_v23  ;;  %v120_v43 = vcombine.high %v116_v37, %v305_v23  ;;  %v123_v44 = vrot.slane %v122_v40, 4  ;;  %v129_v45 = vsel %vm121_vm0, %v117_v38, 0.0 }
  0xa4   :  { %v130_v46 = vrot.slane %v129_v45, 4  ;;  %v137_v47 = vrot.slane %v136_v41, 4  ;;  %v143_v48 = vsel %vm121_vm0, %v118_v39, 0.0  ;;  %v150_v49 = vsel %vm121_vm0, %v109_v36, 0.0 }
  0xa5   :  { %v124_v50 = vadd.f32 %v123_v44, %v122_v40  ;;  %v144_v51 = vrot.slane %v143_v48, 4  ;;  %v151_v52 = vrot.slane %v150_v49, 4  ;;  %v157_v53 = vsel %vm121_vm0, %v119_v42, 0.0 }
  0xa6   :  { %v131_v54 = vadd.f32 %v130_v46, %v129_v45  ;;  %v138_v55 = vadd.f32 %v137_v47, %v136_v41  ;;  %v158_v56 = vrot.slane %v157_v53, 4  ;;  %v164_v57 = vsel %vm121_vm0, %v116_v37, 0.0 }
  0xa7   :  { %v125_v58 = vrot.slane %v124_v50, 2  ;;  %v145_v59 = vadd.f32 %v144_v51, %v143_v48  ;;  %v152_v60 = vadd.f32 %v151_v52, %v150_v49  ;;  %v165_v61 = vrot.slane %v164_v57, 4 }
  0xa8   :  { %v132_v62 = vrot.slane %v131_v54, 2  ;;  %v139_v63 = vrot.slane %v138_v55, 2  ;;  %v159_v0 = vadd.f32 %v158_v56, %v157_v53  ;;  %v171_v1 = vsel %vm121_vm0, %v120_v43, 0.0 }
  0xa9   :  { %v126_v2 = vadd.f32 %v125_v58, %v124_v50  ;;  %v146_v3 = vrot.slane %v145_v59, 2  ;;  %v153_v4 = vrot.slane %v152_v60, 2  ;;  %v166_v5 = vadd.f32 %v165_v61, %v164_v57 }
  0xaa   :  { %v133_v6 = vadd.f32 %v132_v62, %v131_v54  ;;  %v140_v7 = vadd.f32 %v139_v63, %v138_v55  ;;  %v160_v8 = vrot.slane %v159_v0, 2  ;;  %v172_v9 = vrot.slane %v171_v1, 4 }
  0xab   :  { %v127_v10 = vrot.slane %v126_v2, 1  ;;  %v147_v11 = vadd.f32 %v146_v3, %v145_v59  ;;  %v154_v12 = vadd.f32 %v153_v4, %v152_v60  ;;  %v167_v13 = vrot.slane %v166_v5, 2 }
  0xac   :  { %v134_v14 = vrot.slane %v133_v6, 1  ;;  %v141_v15 = vrot.slane %v140_v7, 1  ;;  %v161_v16 = vadd.f32 %v160_v8, %v159_v0  ;;  %v173_v17 = vadd.f32 %v172_v9, %v171_v1 }
  0xad   :  { %v148_v18 = vrot.slane %v147_v11, 1  ;;  %v155_v19 = vrot.slane %v154_v12, 1  ;;  %v168_v20 = vadd.f32 %v167_v13, %v166_v5  ;;  %v128_v21 = vadd.f32 %v127_v10, %v126_v2 }
  0xae   :  { %v135_v22 = vadd.f32 %v134_v14, %v133_v6  ;;  %v162_v23 = vrot.slane %v161_v16, 1  ;;  %v174_v24 = vrot.slane %v173_v17, 2  ;;  %v142_v25 = vadd.f32 %v141_v15, %v140_v7 }
  0xaf   :  { %v169_v26 = vrot.slane %v168_v20, 1  ;;  %v149_v27 = vadd.f32 %v148_v18, %v147_v11  ;;  %v156_v30 = vadd.f32 %v155_v19, %v154_v12 }
  0xb0   :  { %v175_v28 = vadd.f32 %v174_v24, %v173_v17  ;;  %v195_v29 = vsel %vm194_vm1, %v135_v22, %v128_v21  ;;  %v163_v32 = vadd.f32 %v162_v23, %v161_v16 }
  0xb1   :  { %v197_v31 = vsel %vm196_vm2, %v142_v25, %v195_v29  ;;  %v170_v35 = vadd.f32 %v169_v26, %v168_v20 }
  0xb2   :  { %v176_v33 = vrot.slane %v175_v28, 1  ;;  %v199_v34 = vsel %vm198_vm3, %v149_v27, %v197_v31 }
  0xb3   :  { %v201_v36 = vsel %vm200_vm4, %v156_v30, %v199_v34 }
  0xb4   :  { %v177_v37 = vadd.f32 %v176_v33, %v175_v28  ;;  %v203_v38 = vsel %vm202_vm5, %v163_v32, %v201_v36 }
  0xb5   :  { %v205_v39 = vsel %vm204_vm6, %v170_v35, %v203_v38 }
  0xb6   :  { %v207_v40 = vsel %vm206_vm7, %v177_v37, %v205_v39 }
  0xb7   :  { %209 = vst [vmem:[#allocation7] sm:$0xff] %v207_v40 }
  0xb8   :  { %285 = shalt.err (!%p282_p0)
}
  0xb9   :  { %219 = dma.vmem_to_hbm [thread:$0]  %s217_s1, 128, %s351_s3, [#allocation4]  }
  0xba   :  { %298 = dma.done.wait [#allocation4], 128  }
  0xbb   :  { %299 = vsyncadd [#allocation4], 4294967168 }
  0xbc   :  { %223 = vsyncpa [#allocation3], 1 }
  0xbd   :  { %224 = vsyncpa [#allocation6], 1 }
  0xbe   :  { %225 = vsyncpa [#allocation4], 1 }

</bundles_post_ra>
